<compile_context>
chip_gen: v7x
topology: tpu7x:2x2x1
jax: 0.10.0
libtpu: 0.0.40
codegen_flags: <defaults>
</compile_context>

<pallas_src>
import functools

import jax
import jax.numpy as jnp
from jax.experimental import pallas as pl
from jax.experimental.pallas import tpu as pltpu

_F_PAD = 128   # feature dim padded to one full lane width (lane-dense I/O)


def _round_up(a, b):
    return (a + b - 1) // b * b


def _device_config():
    """Per-generation (n_tile_cap, e_tile_cap, vmem_limit_bytes).

    v7x : 64 MiB physical VMEM, 2 TCs  -> small edge tiles, ~44 MiB limit.
    v6e : 128 MiB VMEM                 -> big tiles amortize ~0.35us/grid step.
    v5e : 128 MiB VMEM, 1 vst slot     -> small masks (less spill-store traffic).
    Unknown chips fall back to values that are safe everywhere (<= 48 MiB).
    """
    kind = ""
    try:
        kind = jax.devices()[0].device_kind.lower()
    except Exception:
        pass
    vmem_cap = 0
    try:
        vmem_cap = int(pltpu.get_tpu_info().vmem_capacity_bytes)
    except Exception:
        pass
    if "v7" in kind or (0 < vmem_cap <= 64 * 1024 * 1024):
        return 256, 256, 44 * 1024 * 1024
    if "v6" in kind:
        return 512, 1024, 80 * 1024 * 1024
    if "v5" in kind:
        return 256, 256, 64 * 1024 * 1024
    return 256, 512, 48 * 1024 * 1024


# ---------------------------------------------------------------------------
# Kernel A: edge-parallel weighted gather.
#   msgs[k, :] = edge_weight[k] * h[src[k], :]
# grid = (edge blocks [parallel], node blocks [reduction, last, arbitrary]).
# Each edge block is visited once; h is tiled over node blocks (never fully
# VMEM-resident).
# ---------------------------------------------------------------------------
def _gather_kernel(h_ref, src_ref, ew_ref, msgs_ref, acc_ref):
    j = pl.program_id(1)                          # node-block (reduction) index
    e_tile = src_ref.shape[0]
    n_tile = h_ref.shape[0]

    @pl.when(j == 0)
    def _init():
        acc_ref[...] = jnp.zeros_like(acc_ref)

    # Weighted one-hot gather mask in (e_tile, n_tile) layout: edges on
    # sublanes, local node index on lanes.  src / ew are (e_tile, 1) columns so
    # the mask needs no relayout and the matmul stays in the standard MXU
    # orientation.  Padded edges carry weight 0 -> zero msgs rows.
    lane_node = jax.lax.broadcasted_iota(jnp.int32, (e_tile, n_tile), 1)
    local_src = src_ref[...] - j * n_tile                        # (e_tile, 1)
    woh = jnp.where(lane_node == local_src, ew_ref[...], 0.0)    # (e_tile, n_tile)
    acc_ref[...] += jnp.dot(woh, h_ref[...],
                            preferred_element_type=jnp.float32)

    @pl.when(j == pl.num_programs(1) - 1)
    def _finalize():
        msgs_ref[...] = acc_ref[...]


def _weighted_gather(h, src_col, ew_col, n_tile, e_tile, vmem_limit):
    n_pad, f = h.shape
    e_pad = src_col.shape[0]
    nb, eb = n_pad // n_tile, e_pad // e_tile
    return pl.pallas_call(
        _gather_kernel,
        out_shape=jax.ShapeDtypeStruct((e_pad, f), jnp.float32),
        grid_spec=pltpu.PrefetchScalarGridSpec(
            num_scalar_prefetch=0,
            grid=(eb, nb),                      # reduction (node blocks) last
            in_specs=[
                pl.BlockSpec((n_tile, f), lambda e, j: (j, 0)),   # h node block
                pl.BlockSpec((e_tile, 1), lambda e, j: (e, 0)),   # src column
                pl.BlockSpec((e_tile, 1), lambda e, j: (e, 0)),   # edge-weight column
            ],
            out_specs=pl.BlockSpec((e_tile, f), lambda e, j: (e, 0)),
            scratch_shapes=[pltpu.VMEM((e_tile, f), jnp.float32)],
        ),
        compiler_params=pltpu.CompilerParams(
            dimension_semantics=("parallel", "arbitrary"),
            vmem_limit_bytes=vmem_limit),
        cost_estimate=pl.CostEstimate(
            flops=int(2 * e_pad * n_pad * f),
            transcendentals=0,
            bytes_accessed=int(4 * (n_pad * f * eb + 2 * e_pad + e_pad * f))),
    )(h, src_col, ew_col)


# ---------------------------------------------------------------------------
# Kernel B: scatter-add of messages + rest of the GIN MLP.
#   acc[i_block] += onehot(dst) @ msgs          (edge-block reduction)
#   finalize: y = relu(acc) @ W2 ; then either y @ W1_next or L2-normalize.
# grid = (node blocks [parallel], edge blocks [reduction, last, arbitrary]).
# ---------------------------------------------------------------------------
def _scatter_mlp_kernel(msgs_ref, dst_ref, w2_ref, *rest, final_normalize):
    if final_normalize:
        o_ref, acc_ref = rest
        wnext_ref = None
    else:
        wnext_ref, o_ref, acc_ref = rest

    e = pl.program_id(1)
    n_tile = acc_ref.shape[0]
    e_tile = dst_ref.shape[1]

    @pl.when(e == 0)
    def _init():
        acc_ref[...] = jnp.zeros_like(acc_ref)

    # Scatter one-hot built directly in (n_tile, e_tile) layout from a sublane
    # iota vs. the lane-dense dst row -> no transpose of a large array.  Edge
    # weights already live in msgs; padded edges have msgs == 0.
    row_node = jax.lax.broadcasted_iota(jnp.int32, (n_tile, e_tile), 0)
    local_dst = dst_ref[...] - pl.program_id(0) * n_tile          # (1, e_tile)
    scatter_oh = jnp.where(row_node == local_dst, 1.0, 0.0)       # (n_tile, e_tile)
    acc_ref[...] += jnp.dot(scatter_oh, msgs_ref[...],
                            preferred_element_type=jnp.float32)

    @pl.when(e == pl.num_programs(1) - 1)
    def _finalize():
        y = jnp.dot(jnp.maximum(acc_ref[...], 0.0), w2_ref[...],
                    preferred_element_type=jnp.float32)
        if final_normalize:
            # F.normalize: x / max(||x||, 1e-12) == x * rsqrt(max(||x||^2, 1e-24))
            ssq = jnp.sum(y * y, axis=1, keepdims=True)
            o_ref[...] = y * jax.lax.rsqrt(jnp.maximum(ssq, 1e-24))
        else:
            # Fuse the NEXT layer's hoisted first Linear into this finalize.
            o_ref[...] = jnp.dot(y, wnext_ref[...],
                                 preferred_element_type=jnp.float32)


def _scatter_mlp(msgs, dst_row, w2, wnext, n_pad, n_tile, e_tile, vmem_limit,
                 *, final_normalize):
    e_pad, f = msgs.shape
    nb, eb = n_pad // n_tile, e_pad // e_tile

    in_specs = [
        pl.BlockSpec((e_tile, f), lambda i, e: (e, 0)),    # msgs edge block
        pl.BlockSpec((1, e_tile), lambda i, e: (0, e)),    # dst row (lane-dense)
        pl.BlockSpec((f, f), lambda i, e: (0, 0)),         # W2 (grid-invariant)
    ]
    args = [msgs, dst_row, w2]
    if not final_normalize:
        in_specs.append(pl.BlockSpec((f, f), lambda i, e: (0, 0)))  # next W1
        args.append(wnext)

    n_mats = 1 if final_normalize else 2
    kernel = functools.partial(_scatter_mlp_kernel,
                               final_normalize=final_normalize)
    return pl.pallas_call(
        kernel,
        out_shape=jax.ShapeDtypeStruct((n_pad, f), jnp.float32),
        grid_spec=pltpu.PrefetchScalarGridSpec(
            num_scalar_prefetch=0,
            grid=(nb, eb),                      # reduction (edge blocks) last
            in_specs=in_specs,
            out_specs=pl.BlockSpec((n_tile, f), lambda i, e: (i, 0)),
            scratch_shapes=[pltpu.VMEM((n_tile, f), jnp.float32)],
        ),
        compiler_params=pltpu.CompilerParams(
            dimension_semantics=("parallel", "arbitrary"),
            vmem_limit_bytes=vmem_limit),
        cost_estimate=pl.CostEstimate(
            flops=int(2 * n_pad * e_pad * f + 2 * n_mats * n_pad * f * f),
            transcendentals=int(n_pad if final_normalize else 0),
            bytes_accessed=int(4 * (e_pad * f * nb + e_pad * nb
                                    + n_mats * f * f + n_pad * f))),
    )(*args)


# ---------------------------------------------------------------------------
# Full forward pass.
# ---------------------------------------------------------------------------
def weighted_gin_autoencoder(x, edge_index, edge_weight, params):
    """Forward pass of WeightedGINGraphAutoEncoder (num_layers=2)."""
    n, d = x.shape
    e = edge_index.shape[1]
    h_dim = params["w2_1"].shape[1]
    assert d <= _F_PAD and h_dim <= _F_PAD

    n_tile_cap, e_tile_cap, vmem_limit = _device_config()

    # Node tile: multiple of 8 (sublane); edge tile: multiple of 128 (lane).
    n_req = _round_up(n, 8)
    n_tile = min(n_tile_cap, n_req)
    if n_req >= 512:
        # Keep >= 2 node blocks so both v7x TensorCores get parallel work.
        n_tile = min(n_tile, _round_up(n_req // 2, 8))
    n_pad = _round_up(n, n_tile)

    e_tile = min(e_tile_cap, _round_up(e, 128))
    e_pad = _round_up(e, e_tile)

    f32 = jnp.float32
    x_p = jnp.zeros((n_pad, _F_PAD), f32).at[:n, :d].set(x.astype(f32))

    def pad_w(w):
        ci, co = w.shape
        return jnp.zeros((_F_PAD, _F_PAD), f32).at[:ci, :co].set(w.astype(f32))

    w10, w20 = pad_w(params["w1_0"]), pad_w(params["w2_0"])
    w11, w21 = pad_w(params["w1_1"]), pad_w(params["w2_1"])

    # Edge data.  src / edge weight as (E_pad, 1) columns (they drive the
    # gather mask whose edge axis lives on sublanes); dst as a lane-dense
    # (1, E_pad) row for the scatter mask.  Padded edges carry weight 0.
    src_col = jnp.zeros((e_pad, 1), jnp.int32).at[:e, 0].set(
        edge_index[0].astype(jnp.int32))
    ew_col = jnp.zeros((e_pad, 1), f32).at[:e, 0].set(edge_weight.astype(f32))
    dst_row = jnp.zeros((1, e_pad), jnp.int32).at[0, :e].set(
        edge_index[1].astype(jnp.int32))

    # Layer 0's first Linear, hoisted in front of the aggregation (aggregation
    # is linear, so it commutes).  Trivial GEMM -> plain XLA matmul (review).
    h0 = jnp.dot(x_p, w10, precision=jax.lax.Precision.HIGHEST)

    # Layer 0: weighted gather (each edge visited once), scatter + ReLU + W2_0,
    # fused with layer 1's hoisted first Linear.
    msgs0 = _weighted_gather(h0, src_col, ew_col, n_tile, e_tile, vmem_limit)
    h1 = _scatter_mlp(msgs0, dst_row, w20, w11, n_pad, n_tile, e_tile,
                      vmem_limit, final_normalize=False)

    # Layer 1: weighted gather, scatter + ReLU + W2_1 + row-wise L2 normalize.
    msgs1 = _weighted_gather(h1, src_col, ew_col, n_tile, e_tile, vmem_limit)
    z = _scatter_mlp(msgs1, dst_row, w21, None, n_pad, n_tile, e_tile,
                     vmem_limit, final_normalize=True)
    return z[:n, :h_dim]


# ---------------------------------------------------------------------------
# Pure-JAX reference matching the PyTorch module semantics.
# ---------------------------------------------------------------------------
def _ref_forward(x, edge_index, edge_weight, params):
    hp = jax.lax.Precision.HIGHEST

    def layer(x, w1, w2):
        msgs = edge_weight[:, None] * x[edge_index[0]]
        agg = jax.ops.segment_sum(msgs, edge_index[1], num_segments=x.shape[0])
        h = jnp.maximum(jnp.dot(agg, w1, precision=hp), 0.0)
        return jnp.dot(h, w2, precision=hp)

    x = layer(x, params["w1_0"], params["w2_0"])
    x = layer(x, params["w1_1"], params["w2_1"])
    norm = jnp.linalg.norm(x, axis=1, keepdims=True)
    return x / jnp.maximum(norm, 1e-12)


def _init_params(key, input_dim=4, hidden_dim=8):
    k1, k2, k3, k4 = jax.random.split(key, 4)
    scale = 0.5
    return {
        # layer 0 MLP: Linear(input_dim, hidden) -> ReLU -> Linear(hidden, hidden)
        "w1_0": scale * jax.random.normal(k1, (input_dim, hidden_dim), jnp.float32),
        "w2_0": scale * jax.random.normal(k2, (hidden_dim, hidden_dim), jnp.float32),
        # layer 1 MLP: Linear(hidden, hidden) -> ReLU -> Linear(hidden, hidden)
        "w1_1": scale * jax.random.normal(k3, (hidden_dim, hidden_dim), jnp.float32),
        "w2_1": scale * jax.random.normal(k4, (hidden_dim, hidden_dim), jnp.float32),
    }


if __name__ == "__main__":
    key = jax.random.PRNGKey(0)
    k_x, k_src, k_dst, k_w, k_p = jax.random.split(key, 5)

    N, E, input_dim, hidden_dim = 16, 32, 4, 8

    x = jax.random.normal(k_x, (N, input_dim), jnp.float32)
    src = jax.random.randint(k_src, (E,), 0, N, dtype=jnp.int32)
    dst = jax.random.randint(k_dst, (E,), 0, N, dtype=jnp.int32)
    edge_index = jnp.stack([src, dst], axis=0)                  # (2, E)
    edge_weight = jax.random.uniform(k_w, (E,), jnp.float32)

    params = _init_params(k_p, input_dim, hidden_dim)

    out = weighted_gin_autoencoder(x, edge_index, edge_weight, params)
    out = jax.block_until_ready(out)

    ref = _ref_forward(x, edge_index, edge_weight, params)
    assert out.shape == (N, hidden_dim)
    assert jnp.allclose(out, ref, atol=1e-4, rtol=1e-4), "mismatch vs reference"

    print("KERNEL_OK")
</pallas_src>

<mosaic_0001>
module attributes {stable_mosaic.version = 11 : i64} {
  func.func @_gather_kernel(%arg0: i32, %arg1: i32, %arg2: memref<16x128xf32, #tpu.memory_space<vmem>>, %arg3: memref<128x1xi32, #tpu.memory_space<vmem>>, %arg4: memref<128x1xf32, #tpu.memory_space<vmem>>, %arg5: memref<128x128xf32, #tpu.memory_space<vmem>>, %arg6: memref<128x128xf32, #tpu.memory_space<vmem>>) attributes {dimension_semantics = [#tpu.dimension_semantics<parallel>, #tpu.dimension_semantics<arbitrary>], iteration_bounds = array<i64: 1, 1>, scalar_prefetch = 0 : i64, scratch_operands = 1 : i64, tpu.core_type = #tpu.core_type<tc>, window_params = [{transform_indices = @transform_0, window_bounds = array<i64: 16, 128>}, {transform_indices = @transform_1, window_bounds = array<i64: 128, 1>}, {transform_indices = @transform_2, window_bounds = array<i64: 128, 1>}, {transform_indices = @transform_3, window_bounds = array<i64: 128, 128>}]} {
    %c0_i32 = arith.constant 0 : i32
    %0 = arith.cmpi eq, %arg1, %c0_i32 : i32
    %1 = arith.extui %0 : i1 to i32
    %c0_i32_0 = arith.constant 0 : i32
    %2 = arith.cmpi ne, %1, %c0_i32_0 : i32
    scf.if %2 {
      %cst_13 = arith.constant 0.000000e+00 : f32
      %23 = vector.broadcast %cst_13 : f32 to vector<128x128xf32>
      %c0_14 = arith.constant 0 : index
      %c0_15 = arith.constant 0 : index
      %24 = vector.load %arg6[%c0_14, %c0_15] : memref<128x128xf32, #tpu.memory_space<vmem>>, vector<128x128xf32>
      tpu.vector_store %arg6[%c0_14, %c0_15], %23 {strides = array<i32>} : memref<128x128xf32, #tpu.memory_space<vmem>>, vector<128x128xf32>,
    } else {
    }
    %3 = tpu.iota {dimensions = array<i32: 1>} : vector<128x16xi32>
    %c0 = arith.constant 0 : index
    %c0_1 = arith.constant 0 : index
    %4 = vector.load %arg3[%c0, %c0_1] : memref<128x1xi32, #tpu.memory_space<vmem>>, vector<128x1xi32>
    %c16_i32 = arith.constant 16 : i32
    %5 = arith.muli %arg1, %c16_i32 : i32
    %6 = vector.broadcast %5 : i32 to vector<128x1xi32>
    %7 = arith.subi %4, %6 : vector<128x1xi32>
    %8 = vector.broadcast %7 : vector<128x1xi32> to vector<128x16xi32>
    %9 = arith.cmpi eq, %3, %8 : vector<128x16xi32>
    %c0_2 = arith.constant 0 : index
    %c0_3 = arith.constant 0 : index
    %10 = vector.load %arg4[%c0_2, %c0_3] : memref<128x1xf32, #tpu.memory_space<vmem>>, vector<128x1xf32>
    %cst = arith.constant 0.000000e+00 : f32
    %11 = vector.shape_cast %10 : vector<128x1xf32> to vector<128x1xf32>
    %12 = vector.broadcast %11 : vector<128x1xf32> to vector<128x16xf32>
    %13 = vector.broadcast %cst : f32 to vector<128x16xf32>
    %14 = arith.select %9, %12, %13 : vector<128x16xi1>, vector<128x16xf32>
    %c0_4 = arith.constant 0 : index
    %c0_5 = arith.constant 0 : index
    %15 = vector.load %arg6[%c0_4, %c0_5] : memref<128x128xf32, #tpu.memory_space<vmem>>, vector<128x128xf32>
    %c0_6 = arith.constant 0 : index
    %c0_7 = arith.constant 0 : index
    %16 = vector.load %arg2[%c0_6, %c0_7] : memref<16x128xf32, #tpu.memory_space<vmem>>, vector<16x128xf32>
    %cst_8 = arith.constant dense<0.000000e+00> : vector<128x128xf32>
    %17 = tpu.matmul %14, %16, %cst_8 {dimension_numbers = #tpu.dot_dimension_numbers<[1], [0], [0], [1], [0, 0, 1, 1], [], []>} : vector<128x16xf32>, vector<16x128xf32>, vector<128x128xf32> -> vector<128x128xf32>
    %18 = arith.addf %15, %17 : vector<128x128xf32>
    %c0_9 = arith.constant 0 : index
    %c0_10 = arith.constant 0 : index
    %19 = vector.load %arg6[%c0_9, %c0_10] : memref<128x128xf32, #tpu.memory_space<vmem>>, vector<128x128xf32>
    tpu.vector_store %arg6[%c0_9, %c0_10], %18 {strides = array<i32>} : memref<128x128xf32, #tpu.memory_space<vmem>>, vector<128x128xf32>,
    %c0_i32_11 = arith.constant 0 : i32
    %20 = arith.cmpi eq, %arg1, %c0_i32_11 : i32
    %21 = arith.extui %20 : i1 to i32
    %c0_i32_12 = arith.constant 0 : i32
    %22 = arith.cmpi ne, %21, %c0_i32_12 : i32
    scf.if %22 {
      %c0_13 = arith.constant 0 : index
      %c0_14 = arith.constant 0 : index
      %23 = vector.load %arg6[%c0_13, %c0_14] : memref<128x128xf32, #tpu.memory_space<vmem>>, vector<128x128xf32>
      %c0_15 = arith.constant 0 : index
      %c0_16 = arith.constant 0 : index
      %24 = vector.load %arg5[%c0_15, %c0_16] : memref<128x128xf32, #tpu.memory_space<vmem>>, vector<128x128xf32>
      tpu.vector_store %arg5[%c0_15, %c0_16], %23 {strides = array<i32>} : memref<128x128xf32, #tpu.memory_space<vmem>>, vector<128x128xf32>,
    } else {
    }
    return
  }
  func.func @transform_0(%arg0: i32, %arg1: i32) -> (i32, i32) {
    %c0_i32 = arith.constant 0 : i32
    %c0_i32_0 = arith.constant 0 : i32
    return %arg1, %c0_i32 : i32, i32
  }
  func.func @transform_1(%arg0: i32, %arg1: i32) -> (i32, i32) {
    %c0_i32 = arith.constant 0 : i32
    %c0_i32_0 = arith.constant 0 : i32
    return %arg0, %c0_i32 : i32, i32
  }
  func.func @transform_2(%arg0: i32, %arg1: i32) -> (i32, i32) {
    %c0_i32 = arith.constant 0 : i32
    %c0_i32_0 = arith.constant 0 : i32
    return %arg0, %c0_i32 : i32, i32
  }
  func.func @transform_3(%arg0: i32, %arg1: i32) -> (i32, i32) {
    %c0_i32 = arith.constant 0 : i32
    %c0_i32_0 = arith.constant 0 : i32
    return %arg0, %c0_i32 : i32, i32
  }
}

</mosaic_0001>

<bundles_post_ra>
// kernel: tpu_custom_call.1
= control target key start
LH: loop header
LB: loop body
LE: loop exit
PB: predicated region body
PF: predicated region fallthrough
CT: control target
= control target key end

     0   :  { %v640_v2 = vmov 0   ;;  %s812_s0 = inlined_call_operand.vmem [shape: f32[16,128], index: 0, kind: input, shape index: {}]   ;;  %s813_s1 = inlined_call_operand.vmem [shape: s32[128,1], index: 1, kind: input, shape index: {}]   ;;  %s814_s2 = inlined_call_operand.vmem [shape: f32[128,1], index: 2, kind: input, shape index: {}]   ;;  %s815_s3 = inlined_call_operand.hbm [shape: f32[128,128], index: 3, kind: output, shape index: {}]  }
   0x1   :  { %v38_v0 = vld [vmem:[%s813_s1 + $0x8] sm:$0xff]  ;;  %v37_v1 = vld [vmem:[%s813_s1] sm:$0xff]  ;;  %615 = vset.pattern.permute.xlu1 %v640_v2  ;;  %614 = vset.pattern.permute.xlu0 %v640_v2 }
   0x2   :  { %75 = vperm.xlu1 %615, %v38_v0   ;;  %72 = vperm.xlu0 %614, %v37_v1   ;;  %v46_v3 = vld [vmem:[%s813_s1 + $0x48] sm:$0xff]  ;;  %v45_v4 = vld [vmem:[%s813_s1 + $0x40] sm:$0xff] }
   0x3   :  { %v143_v5 = vld [vmem:[%s814_s2 + $0x40] sm:$0xff]  ;;  %v144_v7 = vld [vmem:[%s814_s2 + $0x48] sm:$0xff] }
   0x4   :  { %v135_v6 = vld [vmem:[%s814_s2] sm:$0xff]  ;;  %v136_v9 = vld [vmem:[%s814_s2 + $0x8] sm:$0xff] }
   0x5   :  { %v263_v8 = vld [vmem:[%s812_s0] sm:$0xff]  ;;  %v264_v10 = vld [vmem:[%s812_s0 + $0x8] sm:$0xff] }
   0x6   :  { %99 = vperm.xlu1 %615, %v46_v3   ;;  %96 = vperm.xlu0 %614, %v45_v4  }
   0xa   :  { %193 = vperm.xlu1 %615, %v143_v5   ;;  %153 = vperm.xlu0 %614, %v135_v6  }
   0xb   :  { %8 = vsyncpa [#allocation4], 0  ;;  %v604_v11 = vpack.c.bf16 %v264_v10, %v263_v8  ;;  %v47_v12 = vld [vmem:[%s813_s1 + $0x50] sm:$0xff]  ;;  %v48_v14 = vld [vmem:[%s813_s1 + $0x58] sm:$0xff]  ;;  %v35_v37 = vlaneseq  ;;  %vm265_vm0 = vcmask 130048  }
   0xc   :  { %v39_v13 = vld [vmem:[%s813_s1 + $0x10] sm:$0xff]  ;;  %v40_v15 = vld [vmem:[%s813_s1 + $0x18] sm:$0xff]  ;;  %v49_v20 = vld [vmem:[%s813_s1 + $0x60] sm:$0xff] }
   0xd   :  { %605 = vmatprep.subr.bf16.mxu0 %v604_v11  ;;  %608 = vmatprep.subr.bf16.mxu1 %v604_v11  ;;  %v145_v16 = vld [vmem:[%s814_s2 + $0x50] sm:$0xff]  ;;  %v146_v18 = vld [vmem:[%s814_s2 + $0x58] sm:$0xff]  ;;  %v41_v21 = vld [vmem:[%s813_s1 + $0x20] sm:$0xff]  ;;  %v766_v39 = vand.u32 127, %v35_v37 }
   0xe   :  { %198 = vperm.xlu1 %615, %v144_v7   ;;  %158 = vperm.xlu0 %614, %v136_v9   ;;  %v137_v17 = vld [vmem:[%s814_s2 + $0x10] sm:$0xff]  ;;  %v138_v19 = vld [vmem:[%s814_s2 + $0x18] sm:$0xff]  ;;  %v50_v22 = vld [vmem:[%s813_s1 + $0x68] sm:$0xff] }
   0xf   :  { %607 = vmatpush3.bf16.msra.mxu0 %v604_v11  ;;  %609 = vmatpush3.bf16.msra.mxu1 %v604_v11  ;;  %v42_v23 = vld [vmem:[%s813_s1 + $0x28] sm:$0xff]  ;;  %v147_v24 = vld [vmem:[%s814_s2 + $0x60] sm:$0xff]  ;;  %v51_v28 = vld [vmem:[%s813_s1 + $0x70] sm:$0xff] }
  0x10   :  { %v139_v25 = vld [vmem:[%s814_s2 + $0x20] sm:$0xff]  ;;  %v148_v26 = vld [vmem:[%s814_s2 + $0x68] sm:$0xff]  ;;  %v43_v29 = vld [vmem:[%s813_s1 + $0x30] sm:$0xff] }
  0x11   :  { %v140_v27 = vld [vmem:[%s814_s2 + $0x28] sm:$0xff]  ;;  %v52_v30 = vld [vmem:[%s813_s1 + $0x78] sm:$0xff]  ;;  %v149_v32 = vld [vmem:[%s814_s2 + $0x70] sm:$0xff] }
  0x12   :  { %102 = vperm.xlu1 %615, %v47_v12   ;;  %78 = vperm.xlu0 %614, %v39_v13   ;;  %v44_v31 = vld [vmem:[%s813_s1 + $0x38] sm:$0xff]  ;;  %v141_v33 = vld [vmem:[%s814_s2 + $0x30] sm:$0xff]  ;;  %s641_s1 = smov [#allocation3]  }
  0x13   :  { %v150_v34 = vld [vmem:[%s814_s2 + $0x78] sm:$0xff] }
  0x14   :  { %v142_v35 = vld [vmem:[%s814_s2 + $0x38] sm:$0xff]  ;;  %s531_s2 = sshll.u32 %s641_s1, 4  ;;  %s532_s2 = int_to_ptr.vmem [resolvable:$true] %s531_s2 }
  0x15   :  { %s616_s24 = scalar_lea.vmem %s532_s2, 2048  ;;  %p621_p1 = scmp.lt.s32.totalorder %s532_s2, %s532_s2 }
  0x16   :  { %105 = vperm.xlu1 %615, %v48_v14   ;;  %81 = vperm.xlu0 %614, %v40_v15   ;;  %p617_p0 = scmp.ne.s32.totalorder %s532_s2, %s616_s24  ;;  %p622_p2 = scmp.lt.s32.totalorder %s616_s24, %s616_s24 }
  0x18   :  { %p623_p3 = por %p622_p2, %p621_p1 }
  0x1a   :  { %203 = vperm.xlu1 %615, %v145_v16   ;;  %163 = vperm.xlu0 %614, %v137_v17   ;;  %p624_p4 = pnand %p623_p3, %p617_p0 }
  0x1e   :  { %208 = vperm.xlu1 %615, %v146_v18   ;;  %168 = vperm.xlu0 %614, %v138_v19  }
  0x22   :  { %108 = vperm.xlu1 %615, %v49_v20   ;;  %84 = vperm.xlu0 %614, %v41_v21  }
  0x26   :  { %111 = vperm.xlu1 %615, %v50_v22   ;;  %87 = vperm.xlu0 %614, %v42_v23  }
  0x2a   :  { %213 = vperm.xlu1 %615, %v147_v24   ;;  %173 = vperm.xlu0 %614, %v139_v25  }
  0x2e   :  { %218 = vperm.xlu1 %615, %v148_v26   ;;  %178 = vperm.xlu0 %614, %v140_v27  }
  0x32   :  { %114 = vperm.xlu1 %615, %v51_v28   ;;  %90 = vperm.xlu0 %614, %v43_v29  }
  0x36   :  { %117 = vperm.xlu1 %615, %v52_v30   ;;  %93 = vperm.xlu0 %614, %v44_v31  }
  0x3a   :  { %223 = vperm.xlu1 %615, %v149_v32   ;;  %183 = vperm.xlu0 %614, %v141_v33  }
  0x3e   :  { %228 = vperm.xlu1 %615, %v150_v34   ;;  %188 = vperm.xlu0 %614, %v142_v35  }
  0x81   :  { %v76_v36 = vpop.permute.xlu1 %75  ;;  %v73_v38 = vpop.permute.xlu0 %72 }
  0x82   :  { %vm119_vm1 = vcmp.eq.s32.totalorder %v766_v39, %v73_v38  ;;  %vm120_vm3 = vcmp.eq.s32.totalorder %v766_v39, %v76_v36 }
  0x85   :  { %v100_v40 = vpop.permute.xlu1 %99  ;;  %v97_v41 = vpop.permute.xlu0 %96 }
  0x86   :  { %vm127_vm2 = vcmp.eq.s32.totalorder %v766_v39, %v97_v41  ;;  %vm128_vm4 = vcmp.eq.s32.totalorder %v766_v39, %v100_v40 }
  0x89   :  { %v194_v42 = vpop.permute.xlu1 %193  ;;  %v154_v43 = vpop.permute.xlu0 %153 }
  0x8a   :  { %v231_v44 = vsel %vm119_vm1, %v154_v43, 0.0  ;;  %v239_v45 = vsel %vm127_vm2, %v194_v42, 0.0 }
  0x8b   :  { %580 = vmatprep.mubr.msk.f32.mxu0 %vm265_vm0, %v231_v44  ;;  %592 = vmatprep.mubr.msk.f32.mxu1 %vm265_vm0, %v239_v45 }
  0x8d   :  { %v199_v46 = vpop.permute.xlu1 %198  ;;  %v159_v47 = vpop.permute.xlu0 %158 }
  0x8e   :  { %v240_v48 = vsel %vm128_vm4, %v199_v46, 0.0  ;;  %v232_v49 = vsel %vm120_vm3, %v159_v47, 0.0 }
  0x8f   :  { %581 = vmatmul.mubr.msk.f32.vlgmr.msra.gmra.mrb[0].mxu0 %vm265_vm0, %v232_v49  ;;  %593 = vmatmul.mubr.msk.f32.vlgmr.msra.gmra.mrb[0].mxu1 %vm265_vm0, %v240_v48 }
  0x91   :  { %v103_v50 = vpop.permute.xlu1 %102  ;;  %v79_v51 = vpop.permute.xlu0 %78 }
  0x92   :  { %vm129_vm5 = vcmp.eq.s32.totalorder %v766_v39, %v103_v50  ;;  %vm121_vm6 = vcmp.eq.s32.totalorder %v766_v39, %v79_v51 }
  0x95   :  { %v106_v52 = vpop.permute.xlu1 %105  ;;  %v82_v53 = vpop.permute.xlu0 %81 }
  0x96   :  { %vm130_vm7 = vcmp.eq.s32.totalorder %v766_v39, %v106_v52  ;;  %vm122_vm8 = vcmp.eq.s32.totalorder %v766_v39, %v82_v53 }
  0x99   :  { %v204_v54 = vpop.permute.xlu1 %203  ;;  %v164_v55 = vpop.permute.xlu0 %163 }
  0x9a   :  { %v241_v56 = vsel %vm129_vm5, %v204_v54, 0.0  ;;  %v233_v57 = vsel %vm121_vm6, %v164_v55, 0.0 }
  0x9b   :  { %583 = vmatprep.mubr.msk.f32.mxu0 %vm265_vm0, %v233_v57  ;;  %595 = vmatprep.mubr.msk.f32.mxu1 %vm265_vm0, %v241_v56 }
  0x9d   :  { %v209_v58 = vpop.permute.xlu1 %208  ;;  %v169_v59 = vpop.permute.xlu0 %168 }
  0x9e   :  { %v242_v60 = vsel %vm130_vm7, %v209_v58, 0.0  ;;  %v234_v61 = vsel %vm122_vm8, %v169_v59, 0.0 }
  0x9f   :  { %584 = vmatmul.mubr.msk.f32.gmra.mrb[2].mxu0 %vm265_vm0, %v234_v61  ;;  %596 = vmatmul.mubr.msk.f32.gmra.mrb[2].mxu1 %vm265_vm0, %v242_v60 }
  0xa1   :  { %v109_v62 = vpop.permute.xlu1 %108  ;;  %v85_v63 = vpop.permute.xlu0 %84 }
  0xa2   :  { %vm131_vm9 = vcmp.eq.s32.totalorder %v766_v39, %v109_v62  ;;  %vm123_vm10 = vcmp.eq.s32.totalorder %v766_v39, %v85_v63 }
  0xa5   :  { %v112_v0 = vpop.permute.xlu1 %111  ;;  %v88_v1 = vpop.permute.xlu0 %87 }
  0xa6   :  { %vm132_vm11 = vcmp.eq.s32.totalorder %v766_v39, %v112_v0  ;;  %vm124_vm12 = vcmp.eq.s32.totalorder %v766_v39, %v88_v1 }
  0xa9   :  { %v214_v2 = vpop.permute.xlu1 %213  ;;  %v174_v3 = vpop.permute.xlu0 %173 }
  0xaa   :  { %v243_v4 = vsel %vm131_vm9, %v214_v2, 0.0  ;;  %v235_v5 = vsel %vm123_vm10, %v174_v3, 0.0 }
  0xab   :  { %586 = vmatprep.mubr.msk.f32.mxu0 %vm265_vm0, %v235_v5  ;;  %598 = vmatprep.mubr.msk.f32.mxu1 %vm265_vm0, %v243_v4 }
  0xad   :  { %v219_v6 = vpop.permute.xlu1 %218  ;;  %v179_v7 = vpop.permute.xlu0 %178 }
  0xae   :  { %v244_v8 = vsel %vm132_vm11, %v219_v6, 0.0  ;;  %v236_v9 = vsel %vm124_vm12, %v179_v7, 0.0 }
  0xaf   :  { %587 = vmatmul.mubr.msk.f32.gmra.mrb[4].mxu0 %vm265_vm0, %v236_v9  ;;  %599 = vmatmul.mubr.msk.f32.gmra.mrb[4].mxu1 %vm265_vm0, %v244_v8 }
  0xb1   :  { %v115_v10 = vpop.permute.xlu1 %114  ;;  %v91_v11 = vpop.permute.xlu0 %90 }
  0xb2   :  { %vm133_vm13 = vcmp.eq.s32.totalorder %v766_v39, %v115_v10  ;;  %vm125_vm14 = vcmp.eq.s32.totalorder %v766_v39, %v91_v11 }
  0xb5   :  { %v118_v12 = vpop.permute.xlu1 %117  ;;  %v94_v13 = vpop.permute.xlu0 %93 }
  0xb6   :  { %vm134_vm15 = vcmp.eq.s32.totalorder %v766_v39, %v118_v12  ;;  %vm126_vm1 = vcmp.eq.s32.totalorder %v766_v39, %v94_v13 }
  0xb9   :  { %v224_v14 = vpop.permute.xlu1 %223  ;;  %v184_v15 = vpop.permute.xlu0 %183 }
  0xba   :  { %v245_v16 = vsel %vm133_vm13, %v224_v14, 0.0  ;;  %v237_v17 = vsel %vm125_vm14, %v184_v15, 0.0 }
  0xbb   :  { %589 = vmatprep.mubr.msk.f32.mxu0 %vm265_vm0, %v237_v17  ;;  %601 = vmatprep.mubr.msk.f32.mxu1 %vm265_vm0, %v245_v16 }
  0xbd   :  { %v229_v18 = vpop.permute.xlu1 %228  ;;  %v189_v19 = vpop.permute.xlu0 %188 }
  0xbe   :  { %v246_v20 = vsel %vm134_vm15, %v229_v18, 0.0  ;;  %v238_v21 = vsel %vm126_vm1, %v189_v19, 0.0 }
  0xbf   :  { %590 = vmatmul.mubr.msk.f32.gmra.mrb[6].mxu0 %vm265_vm0, %v238_v21  ;;  %602 = vmatmul.mubr.msk.f32.gmra.mrb[6].mxu1 %vm265_vm0, %v246_v20 }
 0x162   :  { %v582_v22 = vpop.f32.mrb[0].mxu0  ;;  %v594_v23 = vpop.f32.mrb[0].mxu1 }
 0x163   :  { %511 = vst [vmem:[#allocation3 + $0x8] sm:$0xff] %v582_v22  ;;  %519 = vst [vmem:[#allocation3 + $0x48] sm:$0xff] %v594_v23  ;;  %v380_v24 = vpop.f32.mrb[1].mxu0  ;;  %v420_v25 = vpop.f32.mrb[1].mxu1 }
 0x164   :  { %510 = vst [vmem:[#allocation3] sm:$0xff] %v380_v24  ;;  %518 = vst [vmem:[#allocation3 + $0x40] sm:$0xff] %v420_v25 }
 0x172   :  { %v585_v26 = vpop.f32.mrb[2].mxu0  ;;  %v597_v27 = vpop.f32.mrb[2].mxu1 }
 0x173   :  { %513 = vst [vmem:[#allocation3 + $0x18] sm:$0xff] %v585_v26  ;;  %521 = vst [vmem:[#allocation3 + $0x58] sm:$0xff] %v597_v27  ;;  %v390_v28 = vpop.f32.mrb[3].mxu0  ;;  %v430_v29 = vpop.f32.mrb[3].mxu1 }
 0x174   :  { %512 = vst [vmem:[#allocation3 + $0x10] sm:$0xff] %v390_v28  ;;  %520 = vst [vmem:[#allocation3 + $0x50] sm:$0xff] %v430_v29 }
 0x182   :  { %v588_v30 = vpop.f32.mrb[4].mxu0  ;;  %v600_v31 = vpop.f32.mrb[4].mxu1 }
 0x183   :  { %515 = vst [vmem:[#allocation3 + $0x28] sm:$0xff] %v588_v30  ;;  %523 = vst [vmem:[#allocation3 + $0x68] sm:$0xff] %v600_v31  ;;  %v400_v32 = vpop.f32.mrb[5].mxu0  ;;  %v440_v33 = vpop.f32.mrb[5].mxu1 }
 0x184   :  { %514 = vst [vmem:[#allocation3 + $0x20] sm:$0xff] %v400_v32  ;;  %522 = vst [vmem:[#allocation3 + $0x60] sm:$0xff] %v440_v33 }
 0x192   :  { %v591_v34 = vpop.f32.mrb[6].mxu0  ;;  %v603_v35 = vpop.f32.mrb[6].mxu1 }
 0x193   :  { %517 = vst [vmem:[#allocation3 + $0x38] sm:$0xff] %v591_v34  ;;  %525 = vst [vmem:[#allocation3 + $0x78] sm:$0xff] %v603_v35  ;;  %v410_v36 = vpop.f32.mrb[7].mxu0  ;;  %v450_v37 = vpop.f32.mrb[7].mxu1 }
 0x194   :  { %516 = vst [vmem:[#allocation3 + $0x30] sm:$0xff] %v410_v36  ;;  %524 = vst [vmem:[#allocation3 + $0x70] sm:$0xff] %v450_v37 }
 0x195   :  { %627 = shalt.err (!%p624_p4)
}
 0x196   :  { %s628_s27 = scalar_lea.hbm %s815_s3, 2048 }
 0x197   :  { %p629_p5 = scmp.ne.s32.totalorder %s815_s3, %s628_s27  ;;  %p632_p6 = scmp.lt.u32.totalorder %s628_s27, %s815_s3 }
 0x199   :  { %p634_p7 = pnand %p632_p6, %p629_p5 }
 0x19b   :  { %637 = shalt.err (!%p634_p7)
}
 0x19c   :  { %s642_s5 = smov 128   ;;  %s643_s6 = smov 8  }
 0x19d   :  { %537 = dma.vmem_to_hbm [thread:$0]  %s532_s2, 2048, %s815_s3, [#allocation4], %s642_s5, %s642_s5, %s643_s6  }
 0x19e   :  { %638 = dma.done.wait [#allocation4], 2048  }
 0x19f   :  { %639 = vsyncadd [#allocation4], 4294965248 }
 0x1a0   :  { %541 = vsyncpa [#allocation4], 1 }

</bundles_post_ra>
